<compile_context>
chip_gen: v7x
topology: tpu7x:2x2x1
jax: 0.10.0
libtpu: 0.0.40
codegen_flags: <defaults>
</compile_context>

<pallas_src>
import functools

import jax
import jax.numpy as jnp
from jax.experimental import pallas as pl
from jax.experimental.pallas import tpu as pltpu

_LANE = 128
_SUBLANE = 8


def _round_up(n, m):
    return ((n + m - 1) // m) * m


# --------------------------------------------------------------------------
# Kernel
# --------------------------------------------------------------------------
def _qnet_kernel(x_ref, p_ref, o_ref, *, in_size, out_size, h_p,
                 r_w1, r_b1, r_w2, r_b2):
    # x_ref: (tb, in_size) f32   -- narrow, natural-width activation tile
    # p_ref: (n_rows, h_p) f32   -- packed parameter slab, resident in VMEM
    # o_ref: (tb, out_size) f32  -- narrow output tile (masked store)
    x = x_ref[...]                                   # (tb, in_size)

    # Static slices into the resident parameter slab (no extra DMAs).
    w1 = p_ref[r_w1:r_w1 + in_size, :]               # (in_size, h_p)
    b1 = p_ref[r_b1:r_b1 + 1, :]                     # (1, h_p)
    w2 = p_ref[r_w2:r_w2 + h_p, :]                   # (h_p, h_p); cols >= out_size are 0
    b2 = p_ref[r_b2:r_b2 + 1, :]                     # (1, h_p);   cols >= out_size are 0

    h = jnp.dot(x, w1, preferred_element_type=jnp.float32) + b1    # MXU + VPU
    h = jnp.maximum(h, 0.0)                                        # ReLU
    y = jnp.dot(h, w2, preferred_element_type=jnp.float32) + b2    # (tb, h_p)

    # Narrow store: only the real output columns go back to HBM.
    o_ref[...] = y[:, :out_size].astype(o_ref.dtype)


# --------------------------------------------------------------------------
# Host-side helpers
# --------------------------------------------------------------------------
def pack_params(w1, b1, w2, b2):
    """Pack all parameters into one lane-padded f32 slab.

    Call ONCE per parameter update (not per forward) and reuse the result.
    Weights are (in_features, out_features); biases are 1-D.
    """
    in_size, hidden = w1.shape
    out_size = w2.shape[1]
    h_p = _round_up(hidden, _LANE)               # hidden padded to full lanes
    assert out_size <= h_p and hidden <= h_p

    # Section starts, all 8-row (sublane) aligned.
    r_w1 = 0
    r_b1 = r_w1 + _round_up(in_size, _SUBLANE)
    r_w2 = r_b1 + _SUBLANE
    r_b2 = r_w2 + h_p
    n_rows = r_b2 + _SUBLANE

    slab = jnp.zeros((n_rows, h_p), jnp.float32)
    slab = slab.at[r_w1:r_w1 + in_size, :hidden].set(w1.astype(jnp.float32))
    slab = slab.at[r_b1, :hidden].set(b1.astype(jnp.float32))
    slab = slab.at[r_w2:r_w2 + hidden, :out_size].set(w2.astype(jnp.float32))
    slab = slab.at[r_b2, :out_size].set(b2.astype(jnp.float32))

    meta = dict(in_size=in_size, hidden=hidden, out_size=out_size, h_p=h_p,
                r_w1=r_w1, r_b1=r_b1, r_w2=r_w2, r_b2=r_b2)
    return slab, meta


def _tile_batch(B, tb_max):
    """Balanced batch tiling: choose step count first, then split B evenly."""
    n_steps = max(1, pl.cdiv(B, tb_max))
    if n_steps > 1:
        # Even step count so v7x's 2 TensorCores split the "parallel" axis
        # evenly; negligible extra padding on single-TC v5e/v6e.
        n_steps = _round_up(n_steps, 2)
    tb = _round_up(pl.cdiv(B, n_steps), _SUBLANE)
    b_pad = n_steps * tb
    return tb, b_pad, n_steps


def linear_qnet_forward(x, packed, *, tb_max=2048):
    """Fused forward pass.  x: (B, in) or (in,) f32; packed = pack_params(...)."""
    slab, meta = packed
    in_size = meta["in_size"]
    out_size = meta["out_size"]

    squeeze = (x.ndim == 1)
    if squeeze:
        x = x[None, :]
    B = x.shape[0]
    assert x.shape[1] == in_size

    tb, b_pad, n_steps = _tile_batch(B, tb_max)
    x = x.astype(jnp.float32)
    if b_pad != B:
        # Only pad the (cheap, 11-wide) rows needed to fill the last tile.
        x = jnp.pad(x, ((0, b_pad - B), (0, 0)))

    n_rows, width = slab.shape
    kernel = functools.partial(
        _qnet_kernel,
        in_size=in_size, out_size=out_size, h_p=meta["h_p"],
        r_w1=meta["r_w1"], r_b1=meta["r_b1"],
        r_w2=meta["r_w2"], r_b2=meta["r_b2"])

    out = pl.pallas_call(
        kernel,
        out_shape=jax.ShapeDtypeStruct((b_pad, out_size), jnp.float32),
        grid=(n_steps,),
        in_specs=[
            # x: narrow, natural-width tile, pipelined per grid step.
            pl.BlockSpec((tb, in_size), lambda i: (i, 0)),
            # params: single resident slab (constant index_map -> one DMA).
            pl.BlockSpec((n_rows, width), lambda i: (0, 0)),
        ],
        # Narrow output: masked store, ~42x less HBM writeback than 128 lanes.
        out_specs=pl.BlockSpec((tb, out_size), lambda i: (i, 0)),
        compiler_params=pltpu.CompilerParams(
            dimension_semantics=("parallel",)),
    )(x, slab)

    # Padded rows are NOT zero (they equal relu(b1)@w2+b2) -> slice them away
    # before any downstream reduction.
    out = out[:B]
    if squeeze:
        out = out[0]
    return out


def init_params(key, input_size, hidden_size, output_size):
    """Deterministic init matching nn.Linear's default U(-1/sqrt(fan_in), ...)."""
    k1, k2, k3, k4 = jax.random.split(key, 4)
    bound1 = 1.0 / jnp.sqrt(jnp.float32(input_size))
    bound2 = 1.0 / jnp.sqrt(jnp.float32(hidden_size))
    # Stored as (in, out) — transposed relative to PyTorch's (out, in).
    w1 = jax.random.uniform(k1, (input_size, hidden_size), jnp.float32, -bound1, bound1)
    b1 = jax.random.uniform(k2, (hidden_size,), jnp.float32, -bound1, bound1)
    w2 = jax.random.uniform(k3, (hidden_size, output_size), jnp.float32, -bound2, bound2)
    b2 = jax.random.uniform(k4, (output_size,), jnp.float32, -bound2, bound2)
    return w1, b1, w2, b2


if __name__ == "__main__":
    # Shapes consistent with the snake-game Q-net: 11 -> 32 -> 3.
    input_size, hidden_size, output_size = 11, 32, 3

    key = jax.random.PRNGKey(0)
    kx, kp, kx2 = jax.random.split(key, 3)
    w1, b1, w2, b2 = init_params(kp, input_size, hidden_size, output_size)

    # Pack once (per parameter update), reuse across forward calls.
    packed = pack_params(w1, b1, w2, b2)

    def ref_fwd(xv):
        return jnp.maximum(xv @ w1 + b1, 0.0) @ w2 + b2

    # 1) Small inference-style batch (single grid step).
    batch = 8
    x = jax.random.normal(kx, (batch, input_size), jnp.float32)
    out = linear_qnet_forward(x, packed)
    jax.block_until_ready(out)
    assert out.shape == (batch, output_size)
    assert jnp.allclose(out, ref_fwd(x), atol=1e-5, rtol=1e-5)

    # 2) Training-sized batch that is NOT a multiple of the tile; small tb_max
    #    forces a multi-step grid and exercises balanced tiling + row padding.
    batch2 = 1030
    x2 = jax.random.normal(kx2, (batch2, input_size), jnp.float32)
    out2 = linear_qnet_forward(x2, packed, tb_max=256)
    jax.block_until_ready(out2)
    assert out2.shape == (batch2, output_size)
    assert jnp.allclose(out2, ref_fwd(x2), atol=1e-5, rtol=1e-5)

    # 3) Single-state (1-D) inference path.
    x1 = jax.random.normal(kx, (input_size,), jnp.float32)
    out1 = linear_qnet_forward(x1, packed)
    jax.block_until_ready(out1)
    assert out1.shape == (output_size,)
    assert jnp.allclose(out1, ref_fwd(x1[None, :])[0], atol=1e-5, rtol=1e-5)

    print("KERNEL_OK")
</pallas_src>

<mosaic_0001>
module attributes {stable_mosaic.version = 11 : i64} {
  func.func @_qnet_kernel(%arg0: i32, %arg1: memref<8x11xf32, #tpu.memory_space<vmem>>, %arg2: memref<160x128xf32, #tpu.memory_space<vmem>>, %arg3: memref<8x3xf32, #tpu.memory_space<vmem>>) attributes {dimension_semantics = [#tpu.dimension_semantics<parallel>], iteration_bounds = array<i64: 1>, scalar_prefetch = 0 : i64, scratch_operands = 0 : i64, tpu.core_type = #tpu.core_type<tc>, window_params = [{transform_indices = @transform_0, window_bounds = array<i64: 8, 11>}, {pipeline_mode = #tpu.pipeline_mode<synchronous>, transform_indices = @transform_1, window_bounds = array<i64: 160, 128>}, {transform_indices = @transform_2, window_bounds = array<i64: 8, 3>}]} {
    %c0 = arith.constant 0 : index
    %c0_0 = arith.constant 0 : index
    %0 = vector.load %arg1[%c0, %c0_0] : memref<8x11xf32, #tpu.memory_space<vmem>>, vector<8x11xf32>
    %c0_1 = arith.constant 0 : index
    %c0_2 = arith.constant 0 : index
    %1 = vector.load %arg2[%c0_1, %c0_2] : memref<160x128xf32, #tpu.memory_space<vmem>>, vector<11x128xf32>
    %c16 = arith.constant 16 : index
    %c0_3 = arith.constant 0 : index
    %2 = vector.load %arg2[%c16, %c0_3] : memref<160x128xf32, #tpu.memory_space<vmem>>, vector<1x128xf32>
    %c24 = arith.constant 24 : index
    %c0_4 = arith.constant 0 : index
    %3 = vector.load %arg2[%c24, %c0_4] : memref<160x128xf32, #tpu.memory_space<vmem>>, vector<128x128xf32>
    %c152 = arith.constant 152 : index
    %c0_5 = arith.constant 0 : index
    %4 = vector.load %arg2[%c152, %c0_5] : memref<160x128xf32, #tpu.memory_space<vmem>>, vector<1x128xf32>
    %cst = arith.constant dense<0.000000e+00> : vector<8x128xf32>
    %5 = tpu.matmul %0, %1, %cst {dimension_numbers = #tpu.dot_dimension_numbers<[1], [0], [0], [1], [0, 0, 1, 1], [], []>} : vector<8x11xf32>, vector<11x128xf32>, vector<8x128xf32> -> vector<8x128xf32>
    %6 = vector.broadcast %2 : vector<1x128xf32> to vector<8x128xf32>
    %7 = arith.addf %5, %6 : vector<8x128xf32>
    %cst_6 = arith.constant 0.000000e+00 : f32
    %8 = vector.broadcast %cst_6 : f32 to vector<8x128xf32>
    %9 = arith.maximumf %7, %8 : vector<8x128xf32>
    %cst_7 = arith.constant dense<0.000000e+00> : vector<8x128xf32>
    %10 = tpu.matmul %9, %3, %cst_7 {dimension_numbers = #tpu.dot_dimension_numbers<[1], [0], [0], [1], [0, 0, 1, 1], [], []>} : vector<8x128xf32>, vector<128x128xf32>, vector<8x128xf32> -> vector<8x128xf32>
    %11 = vector.broadcast %4 : vector<1x128xf32> to vector<8x128xf32>
    %12 = arith.addf %10, %11 : vector<8x128xf32>
    %13 = vector.extract_strided_slice %12 {offsets = [0, 0], sizes = [8, 3], strides = [1, 1]} : vector<8x128xf32> to vector<8x3xf32>
    %c0_8 = arith.constant 0 : index
    %c0_9 = arith.constant 0 : index
    %14 = vector.load %arg3[%c0_8, %c0_9] : memref<8x3xf32, #tpu.memory_space<vmem>>, vector<8x3xf32>
    tpu.vector_store %arg3[%c0_8, %c0_9], %13 {strides = array<i32>} : memref<8x3xf32, #tpu.memory_space<vmem>>, vector<8x3xf32>,
    return
  }
  func.func @transform_0(%arg0: i32) -> (i32, i32) {
    %c0_i32 = arith.constant 0 : i32
    %c0_i32_0 = arith.constant 0 : i32
    return %arg0, %c0_i32 : i32, i32
  }
  func.func @transform_1(%arg0: i32) -> (i32, i32) {
    %c0_i32 = arith.constant 0 : i32
    %c0_i32_0 = arith.constant 0 : i32
    %c0_i32_1 = arith.constant 0 : i32
    return %c0_i32, %c0_i32_0 : i32, i32
  }
  func.func @transform_2(%arg0: i32) -> (i32, i32) {
    %c0_i32 = arith.constant 0 : i32
    %c0_i32_0 = arith.constant 0 : i32
    return %arg0, %c0_i32 : i32, i32
  }
}

</mosaic_0001>

<bundles_post_ra>
// kernel: tpu_custom_call.1
= control target key start
LH: loop header
LB: loop body
LE: loop exit
PB: predicated region body
PF: predicated region fallthrough
CT: control target
= control target key end

     0   :  { %7 = vsyncpa [#allocation3], 0  ;;  %s430_s0 = inlined_call_operand.hbm [shape: f32[8,11], index: 0, kind: input, shape index: {}]   ;;  %s431_s1 = inlined_call_operand.hbm [shape: f32[160,128], index: 1, kind: input, shape index: {}]   ;;  %s432_s2 = inlined_call_operand.vmem [shape: f32[8,3], index: 2, kind: output, shape index: {}]  }
   0x1   :  { %8 = vsyncpa [#allocation5], 0  ;;  %s373_s9 = smov [#allocation2]   ;;  %s374_s11 = smov [#allocation4]  }
   0x2   :  { %s15_s10 = sshll.u32 %s373_s9, 4  ;;  %s24_s12 = sshll.u32 %s374_s11, 4  ;;  %s16_s10 = int_to_ptr.vmem [resolvable:$true] %s15_s10  ;;  %s396_s12 = int_to_ptr.vmem [resolvable:$true] %s24_s12 }
   0x3   :  { %s325_s15 = scalar_lea.hbm %s430_s0, 128 }
   0x4   :  { %p326_p0 = scmp.ne.s32.totalorder %s430_s0, %s325_s15  ;;  %p329_p1 = scmp.lt.u32.totalorder %s325_s15, %s430_s0 }
   0x6   :  { %p331_p2 = pnand %p329_p1, %p326_p0 }
   0x8   :  { %334 = shalt.err (!%p331_p2)
}
   0x9   :  { %s335_s20 = scalar_lea.vmem %s16_s10, 128  ;;  %p340_p4 = scmp.lt.s32.totalorder %s16_s10, %s16_s10 }
   0xa   :  { %p336_p3 = scmp.ne.s32.totalorder %s16_s10, %s335_s20  ;;  %p341_p5 = scmp.lt.s32.totalorder %s335_s20, %s335_s20 }
   0xc   :  { %p342_p6 = por %p341_p5, %p340_p4 }
   0xe   :  { %p343_p7 = pnand %p342_p6, %p336_p3 }
  0x10   :  { %346 = shalt.err (!%p343_p7)
}
  0x11   :  { %18 = dma.hbm_to_vmem [thread:$0]  %s430_s0, 128, %s16_s10, [#allocation3]  }
  0x12   :  { %s347_s25 = scalar_lea.hbm %s431_s1, 2560 }
  0x13   :  { %p348_p8 = scmp.ne.s32.totalorder %s431_s1, %s347_s25  ;;  %p351_p9 = scmp.lt.u32.totalorder %s347_s25, %s431_s1 }
  0x15   :  { %p353_p10 = pnand %p351_p9, %p348_p8 }
  0x17   :  { %356 = shalt.err (!%p353_p10)
}
  0x18   :  { %s357_s30 = scalar_lea.vmem %s396_s12, 2560  ;;  %p362_p12 = scmp.lt.s32.totalorder %s396_s12, %s396_s12 }
  0x19   :  { %p358_p11 = scmp.ne.s32.totalorder %s396_s12, %s357_s30  ;;  %p363_p13 = scmp.lt.s32.totalorder %s357_s30, %s357_s30 }
  0x1b   :  { %p364_p0 = por %p363_p13, %p362_p12 }
  0x1d   :  { %p365_p1 = pnand %p364_p0, %p358_p11 }
  0x1f   :  { %368 = shalt.err (!%p365_p1)
}
  0x20   :  { %s375_s0 = smov 128   ;;  %s376_s3 = smov 8  }
  0x21   :  { %30 = dma.hbm_to_vmem [thread:$0]  %s431_s1, 2560, %s396_s12, [#allocation5], %s375_s0, %s375_s0, %s376_s3  }
  0x22   :  { %369 = dma.done.wait [#allocation3], 128  }
  0x23   :  { %370 = vsyncadd [#allocation3], 4294967168 }
  0x24   :  { %371 = dma.done.wait [#allocation5], 2560  }
  0x25   :  { %372 = vsyncadd [#allocation5], 4294964736  ;;  %v377_v0 = vmov 0.0|0.0   ;;  %vm378_vm0 = vmmov 0   ;;  %v379_v1 = vmov 0.0   ;;  %vm66_vm1 = vcmask 1042432  }
  0x26   :  { %289 = vmatprep.subr.bf16.mxu0 %v377_v0  ;;  %293 = vmatprep.subr.bf16.mxu1 %v377_v0  ;;  %v38_v2 = vld [vmem:[#allocation4] sm:$0xff]  ;;  %v39_v3 = vld [vmem:[#allocation4 + $0x8] sm:$0x7]  ;;  %vm380_vm2 = vmmov 1   ;;  %v41_v5 = vld [vmem:[#allocation4 + $0x18] sm:$0xff]  ;;  %vm62_vm4 = vcmask 89088  }
  0x27   :  { %251 = vmatprep.mubr.msk.f32.mxu0 %vm378_vm0, %v379_v1  ;;  %286 = vmatprep.mubr.msk.f32.mxu1 %vm378_vm0, %v379_v1  ;;  %vm291_vm3 = vmpackc.low %vm66_vm1, %vm380_vm2  ;;  %v290_v4 = vpack.c.bf16 %v39_v3, %v38_v2  ;;  %v42_v6 = vld [vmem:[#allocation4 + $0x20] sm:$0xff]  ;;  %v43_v7 = vld [vmem:[#allocation4 + $0x28] sm:$0xff]  ;;  %vm215_vm5 = vcmask 23552  }
  0x28   :  { %v294_v8 = vpack.c.bf16 %v42_v6, %v41_v5  ;;  %v44_v9 = vld [vmem:[#allocation4 + $0x30] sm:$0xff]  ;;  %v37_v10 = vld [vmem:[#allocation2] sm:$0xff]  ;;  %v46_v13 = vld [vmem:[#allocation4 + $0x40] sm:$0xff] }
  0x29   :  { %292 = vmatpush3.bf16.msk.msra.mxu0 %vm291_vm3, %v290_v4  ;;  %v297_v11 = vpack.c.bf16 %v44_v9, %v43_v7  ;;  %v45_v12 = vld [vmem:[#allocation4 + $0x38] sm:$0xff]  ;;  %v47_v15 = vld [vmem:[#allocation4 + $0x48] sm:$0xff]  ;;  %v48_v16 = vld [vmem:[#allocation4 + $0x50] sm:$0xff] }
  0x2a   :  { %295 = vmatpush3.bf16.msra.mxu1 %v294_v8  ;;  %v300_v14 = vpack.c.bf16 %v46_v13, %v45_v12  ;;  %v303_v17 = vpack.c.bf16 %v48_v16, %v47_v15  ;;  %v49_v18 = vld [vmem:[#allocation4 + $0x58] sm:$0xff]  ;;  %v50_v19 = vld [vmem:[#allocation4 + $0x60] sm:$0xff]  ;;  %v51_v21 = vld [vmem:[#allocation4 + $0x68] sm:$0xff] }
  0x2b   :  { %296 = vmatprep.subr.bf16.mxu1 %v377_v0  ;;  %v306_v20 = vpack.c.bf16 %v50_v19, %v49_v18  ;;  %v52_v22 = vld [vmem:[#allocation4 + $0x70] sm:$0xff]  ;;  %v53_v24 = vld [vmem:[#allocation4 + $0x78] sm:$0xff]  ;;  %v54_v25 = vld [vmem:[#allocation4 + $0x80] sm:$0xff] }
  0x2c   :  { %252 = vmatmul.mubr.msk.f32.vlgmr.msra.gmra.mrb[0].mxu0 %vm62_vm4, %v37_v10  ;;  %v309_v23 = vpack.c.bf16 %v52_v22, %v51_v21  ;;  %v312_v26 = vpack.c.bf16 %v54_v25, %v53_v24  ;;  %v55_v27 = vld [vmem:[#allocation4 + $0x88] sm:$0xff]  ;;  %v56_v28 = vld [vmem:[#allocation4 + $0x90] sm:$0xff]  ;;  %v226_v35 = vld [vmem:[#allocation4 + $0x98] ss:$0 sm:$0xff] }
  0x2d   :  { %v315_v29 = vpack.c.bf16 %v56_v28, %v55_v27  ;;  %v223_v30 = vld [vmem:[#allocation4 + $0x10] ss:$0 sm:$0xff] }
  0x2e   :  { %298 = vmatpush3.bf16.msra.mxu1 %v297_v11 }
  0x2f   :  { %299 = vmatprep.subr.bf16.mxu1 %v377_v0 }
  0x32   :  { %301 = vmatpush3.bf16.msra.mxu1 %v300_v14 }
  0x33   :  { %302 = vmatprep.subr.bf16.mxu1 %v377_v0 }
  0x36   :  { %304 = vmatpush3.bf16.msra.mxu1 %v303_v17 }
  0x37   :  { %305 = vmatprep.subr.bf16.mxu1 %v377_v0 }
  0x3a   :  { %307 = vmatpush3.bf16.msra.mxu1 %v306_v20 }
  0x3b   :  { %308 = vmatprep.subr.bf16.mxu1 %v377_v0 }
  0x3e   :  { %310 = vmatpush3.bf16.msra.mxu1 %v309_v23 }
  0x3f   :  { %311 = vmatprep.subr.bf16.mxu1 %v377_v0 }
  0x42   :  { %313 = vmatpush3.bf16.msra.mxu1 %v312_v26 }
  0x43   :  { %314 = vmatprep.subr.bf16.mxu1 %v377_v0 }
  0x46   :  { %316 = vmatpush3.bf16.msra.mxu1 %v315_v29 }
  0xff   :  { %v136_v31 = vpop.f32.mrb[0].mxu0 }
 0x100   :  { %v137_v32 = vadd.f32 %v223_v30, %v136_v31  ;;  %v253_v33 = vpop.f32.mrb[1].mxu0 }
 0x102   :  { %v140_v34 = vmax.f32 %v137_v32, 0.0 }
 0x104   :  { %287 = vmatmul.mubr.f32.vlgmr.msra.gmra.mrb[0].mxu1 %v140_v34 }
 0x1d7   :  { %v211_v36 = vpop.f32.mrb[0].mxu1 }
 0x1d8   :  { %v212_v37 = vadd.f32 %v226_v35, %v211_v36  ;;  %v288_v38 = vpop.f32.mrb[1].mxu1 }
 0x1da   :  { %216 = vst.msk [vmem:[%s432_s2] sm:$0xff] %vm215_vm5, %v212_v37 }
 0x1db   :  { %221 = vsyncpa [#allocation3], 1 }
 0x1dc   :  { %222 = vsyncpa [#allocation5], 1 }

</bundles_post_ra>
